<compile_context>
chip_gen: v7x
topology: tpu7x:2x2x1
jax: 0.10.0
libtpu: 0.0.40
codegen_flags: <defaults>
</compile_context>

<pallas_src>
import functools

import jax
import jax.numpy as jnp
from jax.experimental import pallas as pl
from jax.experimental.pallas import tpu as pltpu


def nn_dyn_kernel(x_ref, u_ref, w1b_ref, w2b_ref, w3b_ref, out_ref,
                  *, dim_x, dim_u, hidden):
    """Folded residual-MLP dynamics: out = MLP(x,u) + x (normalizer pre-folded)."""
    x = x_ref[...]                                  # (TB, dim_x)
    u = u_ref[...]                                  # (TB, dim_u)

    w1b = w1b_ref[...]                              # (dim_x+dim_u+1, H)
    w2b = w2b_ref[...]                              # (H+1, H)
    w3b = w3b_ref[...]                              # (H+1, dim_x)
    dim_in = dim_x + dim_u

    # Layer 1: hstack([x, u]) @ W1' + b1'  ==  x @ W1x' + u @ W1u' + b1'
    h1 = (
        jnp.dot(x, w1b[:dim_x], preferred_element_type=jnp.float32)
        + jnp.dot(u, w1b[dim_x:dim_in], preferred_element_type=jnp.float32)
        + w1b[dim_in:dim_in + 1]
    )
    h1 = jnp.maximum(h1, 0.0)

    # Layer 2
    h2 = jnp.dot(h1, w2b[:hidden], preferred_element_type=jnp.float32) \
        + w2b[hidden:hidden + 1]
    h2 = jnp.maximum(h2, 0.0)

    # Output layer (k_x already folded into W3'/b3') + residual.
    y = jnp.dot(h2, w3b[:hidden], preferred_element_type=jnp.float32) \
        + w3b[hidden:hidden + 1]
    out_ref[...] = y + x


def fold_params(p):
    """One-time algebraic fold of Normalizer + output scale into the weights."""
    inv_kx = 1.0 / p["k_x"]                         # (1, dim_x)
    inv_ku = 1.0 / p["k_u"]                         # (1, dim_u)

    w1x = p["w1x"] * inv_kx.T                       # row-scale (dim_x, H)
    w1u = p["w1u"] * inv_ku.T                       # row-scale (dim_u, H)
    b1 = p["b1"] - (p["b_x"] * inv_kx) @ p["w1x"] - (p["b_u"] * inv_ku) @ p["w1u"]

    w3 = p["w3"] * p["k_x"]                         # col-scale (H, dim_x)
    b3 = p["b3"] * p["k_x"]

    w1b = jnp.concatenate([w1x, w1u, b1], axis=0)           # (dim_x+dim_u+1, H)
    w2b = jnp.concatenate([p["w2"], p["b2"]], axis=0)        # (H+1, H)
    w3b = jnp.concatenate([w3, b3], axis=0)                  # (H+1, dim_x)
    return w1b, w2b, w3b


def nn_dynamical_system_forward(x, u, folded, *, max_block_rows=2048):
    """x: (B, dim_x), u: (B, dim_u) -> x_next: (B, dim_x)."""
    B, dim_x = x.shape
    _, dim_u = u.shape
    w1b, w2b, w3b = folded
    hidden = w2b.shape[1]

    # Batch tile: full batch when small (block == array dim is always legal),
    # otherwise an 8-aligned tile; boundary blocks are masked by Pallas.
    tb = B if B <= max_block_rows else max_block_rows
    grid = (pl.cdiv(B, tb),)

    kernel = functools.partial(
        nn_dyn_kernel, dim_x=dim_x, dim_u=dim_u, hidden=hidden)

    batch_spec = lambda d: pl.BlockSpec((tb, d), lambda i: (i, 0))
    const_spec = lambda shape: pl.BlockSpec(shape, lambda i: (0, 0))

    return pl.pallas_call(
        kernel,
        out_shape=jax.ShapeDtypeStruct((B, dim_x), jnp.float32),
        grid=grid,
        in_specs=[
            batch_spec(dim_x),            # x
            batch_spec(dim_u),            # u
            const_spec(w1b.shape),        # packed layer-1 weights + bias
            const_spec(w2b.shape),        # packed layer-2 weights + bias
            const_spec(w3b.shape),        # packed output weights + bias
        ],
        out_specs=batch_spec(dim_x),
        compiler_params=pltpu.CompilerParams(
            dimension_semantics=("parallel",)),
    )(x, u, w1b, w2b, w3b)


def make_params(key, dim_x, dim_u, hidden):
    """Deterministic synthetic parameters (non-identity normalizers so the
    fold is actually exercised)."""
    dim_in = dim_x + dim_u
    ks = jax.random.split(key, 10)
    scale = lambda fan_in: 1.0 / jnp.sqrt(jnp.float32(fan_in))
    w1 = jax.random.normal(ks[0], (dim_in, hidden), jnp.float32) * scale(dim_in)
    return {
        "k_x": jax.random.uniform(ks[6], (1, dim_x), jnp.float32, 0.5, 2.0),
        "b_x": jax.random.normal(ks[7], (1, dim_x), jnp.float32) * 0.1,
        "k_u": jax.random.uniform(ks[8], (1, dim_u), jnp.float32, 0.5, 2.0),
        "b_u": jax.random.normal(ks[9], (1, dim_u), jnp.float32) * 0.1,
        "w1x": w1[:dim_x, :],
        "w1u": w1[dim_x:, :],
        "b1": jax.random.normal(ks[1], (1, hidden), jnp.float32) * 0.01,
        "w2": jax.random.normal(ks[2], (hidden, hidden), jnp.float32) * scale(hidden),
        "b2": jax.random.normal(ks[3], (1, hidden), jnp.float32) * 0.01,
        "w3": jax.random.normal(ks[4], (hidden, dim_x), jnp.float32) * scale(hidden),
        "b3": jax.random.normal(ks[5], (1, dim_x), jnp.float32) * 0.01,
    }


def reference_forward(x, u, p):
    """Pure-JAX reference of the original (unfolded) module math."""
    x_n = (x - p["b_x"]) / p["k_x"]
    u_n = (u - p["b_u"]) / p["k_u"]
    h = jnp.concatenate([x_n, u_n], axis=-1)
    w1 = jnp.concatenate([p["w1x"], p["w1u"]], axis=0)
    h1 = jnp.maximum(h @ w1 + p["b1"], 0.0)
    h2 = jnp.maximum(h1 @ p["w2"] + p["b2"], 0.0)
    y = h2 @ p["w3"] + p["b3"]
    return p["k_x"] * y + x


if __name__ == "__main__":
    dim_x, dim_u, hidden, batch = 4, 2, 32, 8

    key = jax.random.PRNGKey(0)
    kx_in, ku_in, kp = jax.random.split(key, 3)
    x = jax.random.normal(kx_in, (batch, dim_x), jnp.float32)
    u = jax.random.normal(ku_in, (batch, dim_u), jnp.float32)
    params = make_params(kp, dim_x, dim_u, hidden)
    folded = fold_params(params)

    out = nn_dynamical_system_forward(x, u, folded)
    out = jax.block_until_ready(out)

    ref = reference_forward(x, u, params)
    assert out.shape == (batch, dim_x)
    assert jnp.allclose(out, ref, atol=1e-4, rtol=1e-4)

    print("KERNEL_OK")
</pallas_src>

<mosaic_0001>
module attributes {stable_mosaic.version = 11 : i64} {
  func.func @nn_dyn_kernel(%arg0: i32, %arg1: memref<8x4xf32, #tpu.memory_space<vmem>>, %arg2: memref<8x2xf32, #tpu.memory_space<vmem>>, %arg3: memref<7x32xf32, #tpu.memory_space<vmem>>, %arg4: memref<33x32xf32, #tpu.memory_space<vmem>>, %arg5: memref<33x4xf32, #tpu.memory_space<vmem>>, %arg6: memref<8x4xf32, #tpu.memory_space<vmem>>) attributes {dimension_semantics = [#tpu.dimension_semantics<parallel>], iteration_bounds = array<i64: 1>, scalar_prefetch = 0 : i64, scratch_operands = 0 : i64, tpu.core_type = #tpu.core_type<tc>, window_params = [{transform_indices = @transform_0, window_bounds = array<i64: 8, 4>}, {transform_indices = @transform_1, window_bounds = array<i64: 8, 2>}, {pipeline_mode = #tpu.pipeline_mode<synchronous>, transform_indices = @transform_2, window_bounds = array<i64: 7, 32>}, {pipeline_mode = #tpu.pipeline_mode<synchronous>, transform_indices = @transform_3, window_bounds = array<i64: 33, 32>}, {pipeline_mode = #tpu.pipeline_mode<synchronous>, transform_indices = @transform_4, window_bounds = array<i64: 33, 4>}, {transform_indices = @transform_5, window_bounds = array<i64: 8, 4>}]} {
    %c0 = arith.constant 0 : index
    %c0_0 = arith.constant 0 : index
    %0 = vector.load %arg1[%c0, %c0_0] : memref<8x4xf32, #tpu.memory_space<vmem>>, vector<8x4xf32>
    %c0_1 = arith.constant 0 : index
    %c0_2 = arith.constant 0 : index
    %1 = vector.load %arg2[%c0_1, %c0_2] : memref<8x2xf32, #tpu.memory_space<vmem>>, vector<8x2xf32>
    %c0_3 = arith.constant 0 : index
    %c0_4 = arith.constant 0 : index
    %2 = vector.load %arg3[%c0_3, %c0_4] : memref<7x32xf32, #tpu.memory_space<vmem>>, vector<7x32xf32>
    %c0_5 = arith.constant 0 : index
    %c0_6 = arith.constant 0 : index
    %3 = vector.load %arg4[%c0_5, %c0_6] : memref<33x32xf32, #tpu.memory_space<vmem>>, vector<33x32xf32>
    %c0_7 = arith.constant 0 : index
    %c0_8 = arith.constant 0 : index
    %4 = vector.load %arg5[%c0_7, %c0_8] : memref<33x4xf32, #tpu.memory_space<vmem>>, vector<33x4xf32>
    %5 = vector.extract_strided_slice %2 {offsets = [0, 0], sizes = [4, 32], strides = [1, 1]} : vector<7x32xf32> to vector<4x32xf32>
    %cst = arith.constant dense<0.000000e+00> : vector<8x32xf32>
    %6 = tpu.matmul %0, %5, %cst {dimension_numbers = #tpu.dot_dimension_numbers<[1], [0], [0], [1], [0, 0, 1, 1], [], []>} : vector<8x4xf32>, vector<4x32xf32>, vector<8x32xf32> -> vector<8x32xf32>
    %7 = vector.extract_strided_slice %2 {offsets = [4, 0], sizes = [2, 32], strides = [1, 1]} : vector<7x32xf32> to vector<2x32xf32>
    %cst_9 = arith.constant dense<0.000000e+00> : vector<8x32xf32>
    %8 = tpu.matmul %1, %7, %cst_9 {dimension_numbers = #tpu.dot_dimension_numbers<[1], [0], [0], [1], [0, 0, 1, 1], [], []>} : vector<8x2xf32>, vector<2x32xf32>, vector<8x32xf32> -> vector<8x32xf32>
    %9 = arith.addf %6, %8 : vector<8x32xf32>
    %10 = vector.extract_strided_slice %2 {offsets = [6, 0], sizes = [1, 32], strides = [1, 1]} : vector<7x32xf32> to vector<1x32xf32>
    %11 = vector.broadcast %10 : vector<1x32xf32> to vector<8x32xf32>
    %12 = arith.addf %9, %11 : vector<8x32xf32>
    %cst_10 = arith.constant 0.000000e+00 : f32
    %13 = vector.broadcast %cst_10 : f32 to vector<8x32xf32>
    %14 = arith.maximumf %12, %13 : vector<8x32xf32>
    %15 = vector.extract_strided_slice %3 {offsets = [0, 0], sizes = [32, 32], strides = [1, 1]} : vector<33x32xf32> to vector<32x32xf32>
    %cst_11 = arith.constant dense<0.000000e+00> : vector<8x32xf32>
    %16 = tpu.matmul %14, %15, %cst_11 {dimension_numbers = #tpu.dot_dimension_numbers<[1], [0], [0], [1], [0, 0, 1, 1], [], []>} : vector<8x32xf32>, vector<32x32xf32>, vector<8x32xf32> -> vector<8x32xf32>
    %17 = vector.extract_strided_slice %3 {offsets = [32, 0], sizes = [1, 32], strides = [1, 1]} : vector<33x32xf32> to vector<1x32xf32>
    %18 = vector.broadcast %17 : vector<1x32xf32> to vector<8x32xf32>
    %19 = arith.addf %16, %18 : vector<8x32xf32>
    %cst_12 = arith.constant 0.000000e+00 : f32
    %20 = vector.broadcast %cst_12 : f32 to vector<8x32xf32>
    %21 = arith.maximumf %19, %20 : vector<8x32xf32>
    %22 = vector.extract_strided_slice %4 {offsets = [0, 0], sizes = [32, 4], strides = [1, 1]} : vector<33x4xf32> to vector<32x4xf32>
    %cst_13 = arith.constant dense<0.000000e+00> : vector<8x4xf32>
    %23 = tpu.matmul %21, %22, %cst_13 {dimension_numbers = #tpu.dot_dimension_numbers<[1], [0], [0], [1], [0, 0, 1, 1], [], []>} : vector<8x32xf32>, vector<32x4xf32>, vector<8x4xf32> -> vector<8x4xf32>
    %24 = vector.extract_strided_slice %4 {offsets = [32, 0], sizes = [1, 4], strides = [1, 1]} : vector<33x4xf32> to vector<1x4xf32>
    %25 = vector.broadcast %24 : vector<1x4xf32> to vector<8x4xf32>
    %26 = arith.addf %23, %25 : vector<8x4xf32>
    %27 = arith.addf %26, %0 : vector<8x4xf32>
    %c0_14 = arith.constant 0 : index
    %c0_15 = arith.constant 0 : index
    %28 = vector.load %arg6[%c0_14, %c0_15] : memref<8x4xf32, #tpu.memory_space<vmem>>, vector<8x4xf32>
    tpu.vector_store %arg6[%c0_14, %c0_15], %27 {strides = array<i32>} : memref<8x4xf32, #tpu.memory_space<vmem>>, vector<8x4xf32>,
    return
  }
  func.func @transform_0(%arg0: i32) -> (i32, i32) {
    %c0_i32 = arith.constant 0 : i32
    %c0_i32_0 = arith.constant 0 : i32
    return %arg0, %c0_i32 : i32, i32
  }
  func.func @transform_1(%arg0: i32) -> (i32, i32) {
    %c0_i32 = arith.constant 0 : i32
    %c0_i32_0 = arith.constant 0 : i32
    return %arg0, %c0_i32 : i32, i32
  }
  func.func @transform_2(%arg0: i32) -> (i32, i32) {
    %c0_i32 = arith.constant 0 : i32
    %c0_i32_0 = arith.constant 0 : i32
    %c0_i32_1 = arith.constant 0 : i32
    return %c0_i32, %c0_i32_0 : i32, i32
  }
  func.func @transform_3(%arg0: i32) -> (i32, i32) {
    %c0_i32 = arith.constant 0 : i32
    %c0_i32_0 = arith.constant 0 : i32
    %c0_i32_1 = arith.constant 0 : i32
    return %c0_i32, %c0_i32_0 : i32, i32
  }
  func.func @transform_4(%arg0: i32) -> (i32, i32) {
    %c0_i32 = arith.constant 0 : i32
    %c0_i32_0 = arith.constant 0 : i32
    %c0_i32_1 = arith.constant 0 : i32
    return %c0_i32, %c0_i32_0 : i32, i32
  }
  func.func @transform_5(%arg0: i32) -> (i32, i32) {
    %c0_i32 = arith.constant 0 : i32
    %c0_i32_0 = arith.constant 0 : i32
    return %arg0, %c0_i32 : i32, i32
  }
}

</mosaic_0001>

<bundles_post_ra>
// kernel: tpu_custom_call.1
= control target key start
LH: loop header
LB: loop body
LE: loop exit
PB: predicated region body
PF: predicated region fallthrough
CT: control target
= control target key end

     0   :  { %vm116_vm0 = vcmask 1043456   ;;  %v426_v0 = vmov 0.0   ;;  %vm39_vm1 = vcmask 1041408   ;;  %vm112_vm2 = vcmask 31744   ;;  %s503_s2 = inlined_call_operand.vmem [shape: f32[7,32], index: 2, kind: input, shape index: {}]   ;;  %s504_s0 = inlined_call_operand.vmem [shape: f32[8,4], index: 0, kind: input, shape index: {}]   ;;  %s505_s1 = inlined_call_operand.vmem [shape: f32[8,2], index: 1, kind: input, shape index: {}]   ;;  %s506_s3 = inlined_call_operand.vmem [shape: f32[33,32], index: 3, kind: input, shape index: {}]   ;;  %s507_s4 = inlined_call_operand.vmem [shape: f32[33,4], index: 4, kind: input, shape index: {}]   ;;  %s508_s5 = inlined_call_operand.vmem [shape: f32[8,4], index: 5, kind: output, shape index: {}]  }
   0x1   :  { %384 = vmatprep.subr.mxu1 %v426_v0  ;;  %379 = vmatprep.subr.mxu0 %v426_v0  ;;  %v22_v1 = vld [vmem:[%s503_s2] sm:$0x7f]  ;;  %vm427_vm3 = vmmov 0   ;;  %vm35_vm4 = vcmask 15360   ;;  %v24_v6 = vld [vmem:[%s506_s3 + $0x8] sm:$0xff]  ;;  %v428_v8 = vmov 0.0|0.0   ;;  %v189_v15 = vlaneseq }
   0x2   :  { %v20_v2 = vld [vmem:[%s504_s0] sm:$0xff]  ;;  %385 = vmatpush3.msk.msra.mxu1 %vm116_vm0, %v22_v1  ;;  %386 = vmatprep.mubr.msk.f32.mxu1 %vm427_vm3, %v426_v0  ;;  %v34_v3 = vrot.slane %v22_v1, 4  ;;  %v25_v9 = vld [vmem:[%s506_s3 + $0x10] sm:$0xff]  ;;  %v26_v10 = vld [vmem:[%s506_s3 + $0x18] sm:$0xff]  ;;  %vm199_vm5 = vcmask 261120  }
   0x3   :  { %v21_v4 = vld [vmem:[%s505_s1] sm:$0xff]  ;;  %381 = vmatprep.mubr.msk.f32.mxu0 %vm427_vm3, %v426_v0  ;;  %387 = vmatmul.mubr.msk.f32.vlgmr.msra.gmra.mrb[0].mxu1 %vm112_vm2, %v20_v2  ;;  %v415_v11 = vpack.c.bf16 %v26_v10, %v25_v9  ;;  %v29_v13 = vld [vmem:[%s507_s4 + $0x8] sm:$0xff]  ;;  %v190_v16 = vshrl.u32 %v189_v15, 7  ;;  %v30_v26 = vld [vmem:[%s507_s4 + $0x10] sm:$0xff] }
   0x4   :  { %380 = vmatpush3.msk.msra.mxu0 %vm39_vm1, %v34_v3  ;;  %408 = vmatprep.mubr.msk.f32.mxu1 %vm427_vm3, %v426_v0  ;;  %v23_v5 = vld [vmem:[%s506_s3] sm:$0xff]  ;;  %v31_v27 = vld [vmem:[%s507_s4 + $0x18] sm:$0xff] }
   0x5   :  { %382 = vmatmul.mubr.msk.f32.vlgmr.msra.gmra.mrb[0].mxu0 %vm35_vm4, %v21_v4  ;;  %v412_v7 = vpack.c.bf16 %v24_v6, %v23_v5  ;;  %411 = vmatprep.subr.bf16.mxu0 %v428_v8  ;;  %v28_v12 = vld [vmem:[%s507_s4] sm:$0xff]  ;;  %v191_v17 = vsub.s32 6, %v190_v16  ;;  %v421_v28 = vpack.c.bf16 %v31_v27, %v30_v26 }
   0x6   :  { %397 = vmatprep.mubr.msk.f32.mxu0 %vm427_vm3, %v426_v0  ;;  %417 = vmatprep.subr.bf16.mxu1 %v428_v8  ;;  %v418_v14 = vpack.c.bf16 %v29_v13, %v28_v12  ;;  %v361_v29 = vld [vmem:[%s506_s3 + $0x20] ss:$0 sm:$0xff] }
   0x7   :  { %413 = vmatpush3.bf16.msra.mxu0 %v412_v7  ;;  %v192_v19 = vrot.slane %v22_v1, %v191_v17  ;;  %v363_v34 = vld [vmem:[%s507_s4 + $0x20] ss:$0 sm:$0xff] }
   0x8   :  { %414 = vmatprep.subr.bf16.mxu0 %v428_v8  ;;  %419 = vmatpush3.bf16.msra.mxu1 %v418_v14 }
   0x9   :  { %420 = vmatprep.subr.bf16.mxu1 %v428_v8 }
   0xb   :  { %416 = vmatpush3.bf16.msra.mxu0 %v415_v11 }
   0xc   :  { %422 = vmatpush3.bf16.msra.mxu1 %v421_v28 }
  0xd6   :  { %v185_v18 = vpop.f32.mrb[0].mxu1 }
  0xd7   :  { %v388_v20 = vpop.f32.mrb[1].mxu1 }
  0xd8   :  { %v108_v21 = vpop.f32.mrb[0].mxu0 }
  0xd9   :  { %v186_v22 = vadd.f32 %v185_v18, %v108_v21  ;;  %v383_v23 = vpop.f32.mrb[1].mxu0 }
  0xdb   :  { %v193_v24 = vadd.f32 %v192_v19, %v186_v22 }
  0xdd   :  { %v194_v25 = vmax.f32 %v193_v24, 0.0 }
  0xdf   :  { %398 = vmatmul.mubr.msk.f32.vlgmr.msra.gmra.mrb[2].mxu0 %vm199_vm5, %v194_v25 }
 0x1b2   :  { %v269_v30 = vpop.f32.mrb[2].mxu0 }
 0x1b3   :  { %v270_v31 = vadd.f32 %v361_v29, %v269_v30  ;;  %v399_v32 = vpop.f32.mrb[3].mxu0 }
 0x1b5   :  { %v273_v33 = vmax.f32 %v270_v31, 0.0 }
 0x1b7   :  { %409 = vmatmul.mubr.msk.f32.vlgmr.msra.gmra.mrb[2].mxu1 %vm199_vm5, %v273_v33 }
 0x28a   :  { %v347_v35 = vpop.f32.mrb[2].mxu1 }
 0x28b   :  { %v348_v36 = vadd.f32 %v363_v34, %v347_v35  ;;  %v410_v37 = vpop.f32.mrb[3].mxu1 }
 0x28d   :  { %v351_v38 = vadd.f32 %v348_v36, %v20_v2 }
 0x28f   :  { %352 = vst.msk [vmem:[%s508_s5] sm:$0xff] %vm112_vm2, %v351_v38 }

</bundles_post_ra>
